<compile_context>
chip_gen: v7x
topology: tpu7x:2x2x1
jax: 0.10.0
libtpu: 0.0.40
codegen_flags: <defaults>
</compile_context>

<pallas_src>
import functools

import jax
import jax.numpy as jnp
from jax.experimental import pallas as pl
from jax.experimental.pallas import tpu as pltpu

IN_DIM = 768
HID_DIM = 240          # logical hidden size (PyTorch module)
HID_PAD = 256          # padded hidden size used inside the kernel
IDENTITY_LABELS = 2


def _round_up(x, m):
    return ((x + m - 1) // m) * m


# ---------------------------------------------------------------------------
# Kernel: one batch tile per grid step.
#   h   = relu(x_tile @ W1 + b1)          (bf16 x / W1, f32 accumulate)
#   out = h @ W23 + b23                   (fused gender||race heads, f32)
# ---------------------------------------------------------------------------
def adversary_kernel(x_ref, w1_ref, b1_ref, w23_ref, b23_ref, out_ref):
    h = jnp.dot(x_ref[...], w1_ref[...], preferred_element_type=jnp.float32)
    h = jnp.maximum(h + b1_ref[...], 0.0)
    y = jnp.dot(h, w23_ref[...], preferred_element_type=jnp.float32) + b23_ref[...]
    out_ref[...] = y.astype(out_ref.dtype)


def adversary_shared_forward(x, kparams, *, tile_b=None):
    """x: (B, 768).  Returns (out_gender, out_race), each (B, identity_labels) f32."""
    B, feat = x.shape
    assert feat == IN_DIM
    w1, b1, w23, b23 = kparams["w1"], kparams["b1"], kparams["w23"], kparams["b23"]
    two_nlab = w23.shape[1]
    nlab = two_nlab // 2

    # --- pick a batch tile: multiple of 16 (bf16 sublane packing), <= 512 ---
    if tile_b is None:
        tile_b = min(512, _round_up(B, 16))
    tile_b = _round_up(tile_b, 16)
    Bp = _round_up(B, tile_b)

    x_in = x.astype(jnp.bfloat16)
    if Bp != B:
        x_in = jnp.pad(x_in, ((0, Bp - B), (0, 0)))

    grid = (Bp // tile_b,)

    in_specs = [
        pl.BlockSpec((tile_b, IN_DIM), lambda i: (i, 0)),      # x tile (bf16)
        pl.BlockSpec((IN_DIM, HID_PAD), lambda i: (0, 0)),     # W1 (bf16, padded)
        pl.BlockSpec((1, HID_PAD), lambda i: (0, 0)),          # b1 (f32, padded)
        pl.BlockSpec((HID_PAD, two_nlab), lambda i: (0, 0)),   # W2||W3 (f32, padded)
        pl.BlockSpec((1, two_nlab), lambda i: (0, 0)),         # b2||b3 (f32)
    ]
    out_specs = pl.BlockSpec((tile_b, two_nlab), lambda i: (i, 0))
    out_shape = jax.ShapeDtypeStruct((Bp, two_nlab), jnp.float32)

    flops = 2 * Bp * IN_DIM * HID_PAD + 2 * Bp * HID_PAD * two_nlab
    bytes_accessed = (
        x_in.size * x_in.dtype.itemsize
        + w1.size * w1.dtype.itemsize
        + b1.size * b1.dtype.itemsize
        + w23.size * w23.dtype.itemsize
        + b23.size * b23.dtype.itemsize
        + Bp * two_nlab * 4
    )

    out = pl.pallas_call(
        adversary_kernel,
        grid=grid,
        in_specs=in_specs,
        out_specs=out_specs,
        out_shape=out_shape,
        compiler_params=pltpu.CompilerParams(
            dimension_semantics=("parallel",)),
        cost_estimate=pl.CostEstimate(
            flops=flops, transcendentals=0, bytes_accessed=bytes_accessed),
    )(x_in, w1, b1, w23, b23)

    out = out[:B]
    return out[:, :nlab], out[:, nlab:]


# ---------------------------------------------------------------------------
# Parameter init (mirrors the PyTorch module shapes/init) + kernel layout prep
# ---------------------------------------------------------------------------
def init_params(seed_val, identity_labels=IDENTITY_LABELS):
    """Synthetic init mirroring the module: a1.weight xavier_normal, rest
    PyTorch-Linear-style uniform.  Weights stored (in, out), all f32."""
    key = jax.random.PRNGKey(seed_val)
    k1, k2, k3, k4, k5, k6 = jax.random.split(key, 6)

    xavier_std = (2.0 / (IN_DIM + HID_DIM)) ** 0.5
    w1 = xavier_std * jax.random.normal(k1, (IN_DIM, HID_DIM), dtype=jnp.float32)
    bound1 = 1.0 / (IN_DIM ** 0.5)
    b1 = jax.random.uniform(k2, (1, HID_DIM), minval=-bound1, maxval=bound1,
                            dtype=jnp.float32)

    bound2 = 1.0 / (HID_DIM ** 0.5)
    w2 = jax.random.uniform(k3, (HID_DIM, identity_labels), minval=-bound2,
                            maxval=bound2, dtype=jnp.float32)
    b2 = jax.random.uniform(k4, (1, identity_labels), minval=-bound2,
                            maxval=bound2, dtype=jnp.float32)
    w3 = jax.random.uniform(k5, (HID_DIM, identity_labels), minval=-bound2,
                            maxval=bound2, dtype=jnp.float32)
    b3 = jax.random.uniform(k6, (1, identity_labels), minval=-bound2,
                            maxval=bound2, dtype=jnp.float32)

    return {"w1": w1, "b1": b1, "w2": w2, "b2": b2, "w3": w3, "b3": b3}


def prepare_kernel_params(params):
    """Fuse the two heads, zero-pad hidden 240->256, cast W1 to bf16 (done once
    outside the kernel).  Zero-padded W1 cols / W23 rows keep results exact."""
    pad = HID_PAD - HID_DIM
    w1 = jnp.pad(params["w1"], ((0, 0), (0, pad))).astype(jnp.bfloat16)
    b1 = jnp.pad(params["b1"], ((0, 0), (0, pad))).astype(jnp.float32)
    w23 = jnp.concatenate([params["w2"], params["w3"]], axis=1)
    w23 = jnp.pad(w23, ((0, pad), (0, 0))).astype(jnp.float32)
    b23 = jnp.concatenate([params["b2"], params["b3"]], axis=1).astype(jnp.float32)
    return {"w1": w1, "b1": b1, "w23": w23, "b23": b23}


def reference_forward(x, params):
    h = jnp.maximum(x @ params["w1"] + params["b1"], 0.0)
    return (h @ params["w2"] + params["b2"], h @ params["w3"] + params["b3"])


if __name__ == "__main__":
    seed_val = 0
    params = init_params(seed_val)
    kparams = prepare_kernel_params(params)

    fwd = jax.jit(functools.partial(adversary_shared_forward, tile_b=None))

    # Small batch of pooled 768-d embeddings.
    B = 8
    x = jax.random.normal(jax.random.PRNGKey(0), (B, IN_DIM), dtype=jnp.float32)

    out_gender, out_race = fwd(x, kparams)
    out_gender = jax.block_until_ready(out_gender)
    out_race = jax.block_until_ready(out_race)

    ref_g, ref_r = reference_forward(x, params)
    assert out_gender.shape == (B, IDENTITY_LABELS)
    assert out_race.shape == (B, IDENTITY_LABELS)
    # bf16 x/W1 (f32 accumulate) -> slightly looser tolerance vs f32 reference
    assert jnp.allclose(out_gender, ref_g, atol=3e-2, rtol=3e-2)
    assert jnp.allclose(out_race, ref_r, atol=3e-2, rtol=3e-2)

    # Second check: batch not a multiple of the tile -> pads + multi-step grid.
    B2 = 40
    x2 = jax.random.normal(jax.random.PRNGKey(1), (B2, IN_DIM), dtype=jnp.float32)
    g2, r2 = adversary_shared_forward(x2, kparams, tile_b=16)
    g2 = jax.block_until_ready(g2)
    r2 = jax.block_until_ready(r2)
    rg2, rr2 = reference_forward(x2, params)
    assert g2.shape == (B2, IDENTITY_LABELS) and r2.shape == (B2, IDENTITY_LABELS)
    assert jnp.allclose(g2, rg2, atol=3e-2, rtol=3e-2)
    assert jnp.allclose(r2, rr2, atol=3e-2, rtol=3e-2)

    print("KERNEL_OK")
</pallas_src>

<mosaic_0001>
module attributes {stable_mosaic.version = 11 : i64} {
  func.func @adversary_kernel(%arg0: i32, %arg1: memref<16x768xbf16, #tpu.memory_space<vmem>>, %arg2: memref<768x256xbf16, #tpu.memory_space<vmem>>, %arg3: memref<1x256xf32, #tpu.memory_space<vmem>>, %arg4: memref<256x4xf32, #tpu.memory_space<vmem>>, %arg5: memref<1x4xf32, #tpu.memory_space<vmem>>, %arg6: memref<16x4xf32, #tpu.memory_space<vmem>>) attributes {dimension_semantics = [#tpu.dimension_semantics<parallel>], iteration_bounds = array<i64: 1>, scalar_prefetch = 0 : i64, scratch_operands = 0 : i64, tpu.core_type = #tpu.core_type<tc>, window_params = [{transform_indices = @transform_0, window_bounds = array<i64: 16, 768>}, {pipeline_mode = #tpu.pipeline_mode<synchronous>, transform_indices = @transform_1, window_bounds = array<i64: 768, 256>}, {pipeline_mode = #tpu.pipeline_mode<synchronous>, transform_indices = @transform_2, window_bounds = array<i64: 1, 256>}, {pipeline_mode = #tpu.pipeline_mode<synchronous>, transform_indices = @transform_3, window_bounds = array<i64: 256, 4>}, {pipeline_mode = #tpu.pipeline_mode<synchronous>, transform_indices = @transform_4, window_bounds = array<i64: 1, 4>}, {transform_indices = @transform_5, window_bounds = array<i64: 16, 4>}]} {
    %c0 = arith.constant 0 : index
    %c0_0 = arith.constant 0 : index
    %0 = vector.load %arg1[%c0, %c0_0] : memref<16x768xbf16, #tpu.memory_space<vmem>>, vector<16x768xbf16>
    %c0_1 = arith.constant 0 : index
    %c0_2 = arith.constant 0 : index
    %1 = vector.load %arg2[%c0_1, %c0_2] : memref<768x256xbf16, #tpu.memory_space<vmem>>, vector<768x256xbf16>
    %cst = arith.constant dense<0.000000e+00> : vector<16x256xf32>
    %2 = tpu.matmul %0, %1, %cst {dimension_numbers = #tpu.dot_dimension_numbers<[1], [0], [0], [1], [0, 0, 1, 1], [], []>} : vector<16x768xbf16>, vector<768x256xbf16>, vector<16x256xf32> -> vector<16x256xf32>
    %c0_3 = arith.constant 0 : index
    %c0_4 = arith.constant 0 : index
    %3 = vector.load %arg3[%c0_3, %c0_4] : memref<1x256xf32, #tpu.memory_space<vmem>>, vector<1x256xf32>
    %4 = vector.broadcast %3 : vector<1x256xf32> to vector<16x256xf32>
    %5 = arith.addf %2, %4 : vector<16x256xf32>
    %cst_5 = arith.constant 0.000000e+00 : f32
    %6 = vector.broadcast %cst_5 : f32 to vector<16x256xf32>
    %7 = arith.maximumf %5, %6 : vector<16x256xf32>
    %c0_6 = arith.constant 0 : index
    %c0_7 = arith.constant 0 : index
    %8 = vector.load %arg4[%c0_6, %c0_7] : memref<256x4xf32, #tpu.memory_space<vmem>>, vector<256x4xf32>
    %cst_8 = arith.constant dense<0.000000e+00> : vector<16x4xf32>
    %9 = tpu.matmul %7, %8, %cst_8 {dimension_numbers = #tpu.dot_dimension_numbers<[1], [0], [0], [1], [0, 0, 1, 1], [], []>} : vector<16x256xf32>, vector<256x4xf32>, vector<16x4xf32> -> vector<16x4xf32>
    %c0_9 = arith.constant 0 : index
    %c0_10 = arith.constant 0 : index
    %10 = vector.load %arg5[%c0_9, %c0_10] : memref<1x4xf32, #tpu.memory_space<vmem>>, vector<1x4xf32>
    %11 = vector.broadcast %10 : vector<1x4xf32> to vector<16x4xf32>
    %12 = arith.addf %9, %11 : vector<16x4xf32>
    %c0_11 = arith.constant 0 : index
    %c0_12 = arith.constant 0 : index
    %13 = vector.load %arg6[%c0_11, %c0_12] : memref<16x4xf32, #tpu.memory_space<vmem>>, vector<16x4xf32>
    tpu.vector_store %arg6[%c0_11, %c0_12], %12 {strides = array<i32>} : memref<16x4xf32, #tpu.memory_space<vmem>>, vector<16x4xf32>,
    return
  }
  func.func @transform_0(%arg0: i32) -> (i32, i32) {
    %c0_i32 = arith.constant 0 : i32
    %c0_i32_0 = arith.constant 0 : i32
    return %arg0, %c0_i32 : i32, i32
  }
  func.func @transform_1(%arg0: i32) -> (i32, i32) {
    %c0_i32 = arith.constant 0 : i32
    %c0_i32_0 = arith.constant 0 : i32
    %c0_i32_1 = arith.constant 0 : i32
    return %c0_i32, %c0_i32_0 : i32, i32
  }
  func.func @transform_2(%arg0: i32) -> (i32, i32) {
    %c0_i32 = arith.constant 0 : i32
    %c0_i32_0 = arith.constant 0 : i32
    %c0_i32_1 = arith.constant 0 : i32
    return %c0_i32, %c0_i32_0 : i32, i32
  }
  func.func @transform_3(%arg0: i32) -> (i32, i32) {
    %c0_i32 = arith.constant 0 : i32
    %c0_i32_0 = arith.constant 0 : i32
    %c0_i32_1 = arith.constant 0 : i32
    return %c0_i32, %c0_i32_0 : i32, i32
  }
  func.func @transform_4(%arg0: i32) -> (i32, i32) {
    %c0_i32 = arith.constant 0 : i32
    %c0_i32_0 = arith.constant 0 : i32
    %c0_i32_1 = arith.constant 0 : i32
    return %c0_i32, %c0_i32_0 : i32, i32
  }
  func.func @transform_5(%arg0: i32) -> (i32, i32) {
    %c0_i32 = arith.constant 0 : i32
    %c0_i32_0 = arith.constant 0 : i32
    return %arg0, %c0_i32 : i32, i32
  }
}

</mosaic_0001>

<bundles_post_ra>
// kernel: adversary_shared_forward.1
= control target key start
LH: loop header
LB: loop body
LE: loop exit
PB: predicated region body
PF: predicated region fallthrough
CT: control target
= control target key end

     0   :  { %10 = vsyncpa [#allocation3], 0  ;;  %s1278_s18 = smov [#allocation2]   ;;  %s1449_s0 = inlined_call_operand.vmem [shape: bf16[16,768], index: 0, kind: input, shape index: {}]   ;;  %s1450_s1 = inlined_call_operand.hbm [shape: bf16[768,256], index: 1, kind: input, shape index: {}]   ;;  %s1451_s2 = inlined_call_operand.vmem [shape: f32[1,256], index: 2, kind: input, shape index: {}]   ;;  %s1452_s3 = inlined_call_operand.vmem [shape: f32[256,4], index: 3, kind: input, shape index: {}]   ;;  %s1453_s4 = inlined_call_operand.vmem [shape: f32[1,4], index: 4, kind: input, shape index: {}]   ;;  %s1454_s5 = inlined_call_operand.vmem [shape: f32[16,4], index: 5, kind: output, shape index: {}]  }
   0x1   :  { %s18_s19 = sshll.u32 %s1278_s18, 4  ;;  %s1254_s22 = scalar_lea.hbm %s1450_s1, 12288  ;;  %s19_s19 = int_to_ptr.vmem [resolvable:$true] %s18_s19 }
   0x2   :  { %p1255_p0 = scmp.ne.s32.totalorder %s1450_s1, %s1254_s22  ;;  %p1258_p1 = scmp.lt.u32.totalorder %s1254_s22, %s1450_s1 }
   0x4   :  { %p1260_p2 = pnand %p1258_p1, %p1255_p0 }
   0x6   :  { %1263 = shalt.err (!%p1260_p2)
}
   0x7   :  { %s1264_s27 = scalar_lea.vmem %s19_s19, 12288  ;;  %p1269_p4 = scmp.lt.s32.totalorder %s19_s19, %s19_s19 }
   0x8   :  { %p1265_p3 = scmp.ne.s32.totalorder %s19_s19, %s1264_s27  ;;  %p1270_p5 = scmp.lt.s32.totalorder %s1264_s27, %s1264_s27 }
   0xa   :  { %p1271_p6 = por %p1270_p5, %p1269_p4 }
   0xc   :  { %p1272_p7 = pnand %p1271_p6, %p1265_p3 }
   0xe   :  { %1275 = shalt.err (!%p1272_p7)
}
   0xf   :  { %s1279_s28 = smov 128   ;;  %s1280_s29 = smov 8  }
  0x10   :  { %24 = dma.hbm_to_vmem [thread:$0]  %s1450_s1, 12288, %s19_s19, [#allocation3], %s1279_s28, %s1279_s28, %s1280_s29  }
  0x11   :  { %1276 = dma.done.wait [#allocation3], 12288  }
  0x12   :  { %1277 = vsyncadd [#allocation3], 4294955008  ;;  %v1101_v0 = vld [vmem:[#allocation2 + $0x104] ss:$8 sps:$4 sm:$0xff]   ;;  %v1103_v1 = vld [vmem:[#allocation2 + $0x100] ss:$8 sps:$4 sm:$0xff]  }
  0x13   :  { %701 = vmatprep.subr.bf16.mxu0 %v1101_v0  ;;  %v1104_v2 = vld [vmem:[#allocation2 + $0x114] ss:$8 sps:$4 sm:$0xff]   ;;  %v1106_v3 = vld [vmem:[#allocation2 + $0x110] ss:$8 sps:$4 sm:$0xff]   ;;  %v1107_v4 = vld [vmem:[#allocation2 + $0x124] ss:$8 sps:$4 sm:$0xff]  }
  0x14   :  { %702 = vmatpush1.bf16.msra.mxu0 %v1103_v1  ;;  %v1109_v5 = vld [vmem:[#allocation2 + $0x120] ss:$8 sps:$4 sm:$0xff]   ;;  %v1110_v6 = vld [vmem:[#allocation2 + $0x134] ss:$8 sps:$4 sm:$0xff]   ;;  %v1112_v7 = vld [vmem:[#allocation2 + $0x130] ss:$8 sps:$4 sm:$0xff]  }
  0x15   :  { %703 = vmatprep.subr.bf16.mxu0 %v1104_v2  ;;  %v1113_v8 = vld [vmem:[#allocation2 + $0x144] ss:$8 sps:$4 sm:$0xff]   ;;  %v1115_v9 = vld [vmem:[#allocation2 + $0x140] ss:$8 sps:$4 sm:$0xff]   ;;  %v1116_v10 = vld [vmem:[#allocation2 + $0x154] ss:$8 sps:$4 sm:$0xff]  }
  0x16   :  { %v1118_v11 = vld [vmem:[#allocation2 + $0x150] ss:$8 sps:$4 sm:$0xff]   ;;  %v1119_v12 = vld [vmem:[#allocation2 + $0x164] ss:$8 sps:$4 sm:$0xff]   ;;  %v1148_v14 = vld [vmem:[#allocation2] ss:$8 sps:$4 sm:$0xff]  }
  0x17   :  { %v1146_v13 = vld [vmem:[#allocation2 + $0x4] ss:$8 sps:$4 sm:$0xff]   ;;  %v1121_v15 = vld [vmem:[#allocation2 + $0x160] ss:$8 sps:$4 sm:$0xff]   ;;  %v1152_v16 = vld [vmem:[#allocation2 + $0x14] ss:$8 sps:$4 sm:$0xff]  }
  0x18   :  { %704 = vmatpush1.bf16.msra.mxu0 %v1106_v3  ;;  %658 = vmatprep.subr.bf16.mxu1 %v1146_v13  ;;  %v1154_v17 = vld [vmem:[#allocation2 + $0x10] ss:$8 sps:$4 sm:$0xff]   ;;  %v1122_v18 = vld [vmem:[#allocation2 + $0x174] ss:$8 sps:$4 sm:$0xff]   ;;  %v1157_v19 = vld [vmem:[%s1449_s0 + $0xc] ss:$24 sps:$4 sm:$0xff]  }
  0x19   :  { %705 = vmatprep.subr.bf16.mxu0 %v1107_v4  ;;  %659 = vmatpush1.bf16.msra.mxu1 %v1148_v14  ;;  %v1124_v20 = vld [vmem:[#allocation2 + $0x170] ss:$8 sps:$4 sm:$0xff]   ;;  %v1161_v21 = vld [vmem:[#allocation2 + $0x24] ss:$8 sps:$4 sm:$0xff]   ;;  %v1163_v22 = vld [vmem:[#allocation2 + $0x20] ss:$8 sps:$4 sm:$0xff]  }
  0x1a   :  { %660 = vmatprep.subr.bf16.mxu1 %v1152_v16  ;;  %v1125_v23 = vld [vmem:[#allocation2 + $0x184] ss:$8 sps:$4 sm:$0xff]   ;;  %733 = vmatprep.mubr.bf16.mxu0 %v1157_v19  ;;  %v1127_v24 = vld [vmem:[#allocation2 + $0x180] ss:$8 sps:$4 sm:$0xff]   ;;  %v1167_v25 = vld [vmem:[#allocation2 + $0x34] ss:$8 sps:$4 sm:$0xff]  }
  0x1b   :  { %v1128_v26 = vld [vmem:[#allocation2 + $0x194] ss:$8 sps:$4 sm:$0xff]   ;;  %v1169_v27 = vld [vmem:[#allocation2 + $0x30] ss:$8 sps:$4 sm:$0xff]   ;;  %v1173_v28 = vld [vmem:[#allocation2 + $0x44] ss:$8 sps:$4 sm:$0xff]  }
  0x1c   :  { %706 = vmatpush1.bf16.msra.mxu0 %v1109_v5  ;;  %v1130_v29 = vld [vmem:[#allocation2 + $0x190] ss:$8 sps:$4 sm:$0xff]   ;;  %v1131_v30 = vld [vmem:[#allocation2 + $0x1a4] ss:$8 sps:$4 sm:$0xff]   ;;  %v1175_v31 = vld [vmem:[#allocation2 + $0x40] ss:$8 sps:$4 sm:$0xff]  }
  0x1d   :  { %707 = vmatprep.subr.bf16.mxu0 %v1110_v6  ;;  %661 = vmatpush1.bf16.msra.mxu1 %v1154_v17  ;;  %v1179_v32 = vld [vmem:[#allocation2 + $0x54] ss:$8 sps:$4 sm:$0xff]   ;;  %v1133_v33 = vld [vmem:[#allocation2 + $0x1a0] ss:$8 sps:$4 sm:$0xff]   ;;  %v1181_v35 = vld [vmem:[#allocation2 + $0x50] ss:$8 sps:$4 sm:$0xff]  }
  0x1e   :  { %662 = vmatprep.subr.bf16.mxu1 %v1161_v21  ;;  %v1134_v34 = vld [vmem:[#allocation2 + $0x1b4] ss:$8 sps:$4 sm:$0xff]   ;;  %v1185_v36 = vld [vmem:[#allocation2 + $0x64] ss:$8 sps:$4 sm:$0xff]   ;;  %v1136_v37 = vld [vmem:[#allocation2 + $0x1b0] ss:$8 sps:$4 sm:$0xff]  }
  0x1f   :  { %v1137_v38 = vld [vmem:[#allocation2 + $0x1c4] ss:$8 sps:$4 sm:$0xff]   ;;  %v1187_v39 = vld [vmem:[#allocation2 + $0x60] ss:$8 sps:$4 sm:$0xff]   ;;  %v1191_v40 = vld [vmem:[#allocation2 + $0x74] ss:$8 sps:$4 sm:$0xff]  }
  0x20   :  { %708 = vmatpush1.bf16.msra.mxu0 %v1112_v7  ;;  %v1139_v41 = vld [vmem:[#allocation2 + $0x1c0] ss:$8 sps:$4 sm:$0xff]   ;;  %v1140_v42 = vld [vmem:[#allocation2 + $0x1d4] ss:$8 sps:$4 sm:$0xff]   ;;  %v1193_v43 = vld [vmem:[#allocation2 + $0x70] ss:$8 sps:$4 sm:$0xff]  }
  0x21   :  { %709 = vmatprep.subr.bf16.mxu0 %v1113_v8  ;;  %663 = vmatpush1.bf16.msra.mxu1 %v1163_v22  ;;  %v1197_v44 = vld [vmem:[#allocation2 + $0x84] ss:$8 sps:$4 sm:$0xff]   ;;  %v1142_v45 = vld [vmem:[#allocation2 + $0x1d0] ss:$8 sps:$4 sm:$0xff]   ;;  %v1199_v47 = vld [vmem:[#allocation2 + $0x80] ss:$8 sps:$4 sm:$0xff]  }
  0x22   :  { %664 = vmatprep.subr.bf16.mxu1 %v1167_v25  ;;  %v1143_v46 = vld [vmem:[#allocation2 + $0x1e4] ss:$8 sps:$4 sm:$0xff]   ;;  %v1203_v48 = vld [vmem:[#allocation2 + $0x94] ss:$8 sps:$4 sm:$0xff]   ;;  %v1145_v49 = vld [vmem:[#allocation2 + $0x1e0] ss:$8 sps:$4 sm:$0xff]  }
  0x23   :  { %v1149_v50 = vld [vmem:[#allocation2 + $0x1f4] ss:$8 sps:$4 sm:$0xff]   ;;  %v1205_v51 = vld [vmem:[#allocation2 + $0x90] ss:$8 sps:$4 sm:$0xff]   ;;  %v1209_v52 = vld [vmem:[#allocation2 + $0xa4] ss:$8 sps:$4 sm:$0xff]  }
  0x24   :  { %710 = vmatpush1.bf16.msra.mxu0 %v1115_v9  ;;  %v1151_v53 = vld [vmem:[#allocation2 + $0x1f0] ss:$8 sps:$4 sm:$0xff]   ;;  %v1160_v54 = vld [vmem:[#allocation2 + $0x204] ss:$8 sps:$4 sm:$0xff]   ;;  %v1211_v55 = vld [vmem:[#allocation2 + $0xa0] ss:$8 sps:$4 sm:$0xff]  }
  0x25   :  { %711 = vmatprep.subr.bf16.mxu0 %v1116_v10  ;;  %665 = vmatpush1.bf16.msra.mxu1 %v1169_v27  ;;  %v1215_v56 = vld [vmem:[#allocation2 + $0xb4] ss:$8 sps:$4 sm:$0xff]   ;;  %v1155_v57 = vld [vmem:[%s1449_s0 + $0x8] ss:$24 sps:$4 sm:$0xff]   ;;  %v1217_v60 = vld [vmem:[#allocation2 + $0xb0] ss:$8 sps:$4 sm:$0xff]  }
  0x26   :  { %666 = vmatprep.subr.bf16.mxu1 %v1173_v28  ;;  %v1158_v58 = vld [vmem:[#allocation2 + $0x200] ss:$8 sps:$4 sm:$0xff]   ;;  %v1166_v59 = vld [vmem:[#allocation2 + $0x214] ss:$8 sps:$4 sm:$0xff]   ;;  %v1221_v61 = vld [vmem:[#allocation2 + $0xc4] ss:$8 sps:$4 sm:$0xff]  }
  0x27   :  { %v1247_v62 = vld [vmem:[%s1449_s0 + $0x4] ss:$24 sps:$4 sm:$0xff]   ;;  %v1164_v63 = vld [vmem:[#allocation2 + $0x210] ss:$8 sps:$4 sm:$0xff]   ;;  %v1223_v0 = vld [vmem:[#allocation2 + $0xc0] ss:$8 sps:$4 sm:$0xff]  }
  0x28   :  { %712 = vmatpush1.bf16.msra.mxu0 %v1118_v11  ;;  %v1253_v1 = vld [vmem:[%s1449_s0 + $0x14] ss:$24 sps:$4 sm:$0xff]   ;;  %690 = vmatprep.mubr.bf16.mxu1 %v1247_v62  ;;  %v1170_v4 = vld [vmem:[#allocation2 + $0x220] ss:$8 sps:$4 sm:$0xff]   ;;  %v1229_v5 = vld [vmem:[#allocation2 + $0xd0] ss:$8 sps:$4 sm:$0xff]  }
  0x29   :  { %713 = vmatprep.subr.bf16.mxu0 %v1119_v12  ;;  %667 = vmatpush1.bf16.msra.mxu1 %v1175_v31  ;;  %v1172_v2 = vld [vmem:[#allocation2 + $0x224] ss:$8 sps:$4 sm:$0xff]   ;;  %v1227_v3 = vld [vmem:[#allocation2 + $0xd4] ss:$8 sps:$4 sm:$0xff]   ;;  %v1176_v8 = vld [vmem:[#allocation2 + $0x230] ss:$8 sps:$4 sm:$0xff]  }
  0x2a   :  { %668 = vmatprep.subr.bf16.mxu1 %v1179_v32  ;;  %v1178_v6 = vld [vmem:[#allocation2 + $0x234] ss:$8 sps:$4 sm:$0xff]   ;;  %v1233_v7 = vld [vmem:[#allocation2 + $0xe4] ss:$8 sps:$4 sm:$0xff]   ;;  %v1235_v9 = vld [vmem:[#allocation2 + $0xe0] ss:$8 sps:$4 sm:$0xff]  }
  0x2b   :  { %v1184_v10 = vld [vmem:[#allocation2 + $0x244] ss:$8 sps:$4 sm:$0xff]   ;;  %v1239_v11 = vld [vmem:[#allocation2 + $0xf4] ss:$8 sps:$4 sm:$0xff]   ;;  %v1182_v14 = vld [vmem:[#allocation2 + $0x240] ss:$8 sps:$4 sm:$0xff]  }
  0x2c   :  { %714 = vmatpush1.bf16.msra.mxu0 %v1121_v15  ;;  %v807_v12 = vld [vmem:[%s1452_s3 + $0x80] sm:$0xff]  ;;  %v808_v13 = vld [vmem:[%s1452_s3 + $0x88] sm:$0xff]  ;;  %v1241_v15 = vld [vmem:[#allocation2 + $0xf0] ss:$8 sps:$4 sm:$0xff]   ;;  %vm905_vm0 = vcmask 31744  }
  0x2d   :  { %715 = vmatprep.subr.bf16.mxu0 %v1122_v18  ;;  %669 = vmatpush1.bf16.msra.mxu1 %v1181_v35  ;;  %v1190_v16 = vld [vmem:[#allocation2 + $0x254] ss:$8 sps:$4 sm:$0xff]   ;;  %v1054_v17 = vpack.c.bf16 %v808_v13, %v807_v12  ;;  %v791_v18 = vld [vmem:[%s1452_s3] sm:$0xff]  ;;  %v792_v19 = vld [vmem:[%s1452_s3 + $0x8] sm:$0xff] }
  0x2e   :  { %670 = vmatprep.subr.bf16.mxu1 %v1185_v36  ;;  %v810_v21 = vld [vmem:[%s1452_s3 + $0x98] sm:$0xff]  ;;  %v1196_v25 = vld [vmem:[#allocation2 + $0x264] ss:$8 sps:$4 sm:$0xff]   ;;  %v793_v27 = vld [vmem:[%s1452_s3 + $0x10] sm:$0xff] }
  0x2f   :  { %v1245_v22 = vld [vmem:[%s1449_s0] ss:$24 sps:$4 sm:$0xff]   ;;  %v796_v36 = vld [vmem:[%s1452_s3 + $0x28] sm:$0xff] }
  0x30   :  { %716 = vmatpush1.bf16.msra.mxu0 %v1124_v20  ;;  %v809_v20 = vld [vmem:[%s1452_s3 + $0x90] sm:$0xff]  ;;  %v794_v28 = vld [vmem:[%s1452_s3 + $0x18] sm:$0xff]  ;;  %v1194_v31 = vld [vmem:[#allocation2 + $0x260] ss:$8 sps:$4 sm:$0xff]  }
  0x31   :  { %717 = vmatprep.subr.bf16.mxu0 %v1125_v23  ;;  %671 = vmatpush1.bf16.msra.mxu1 %v1187_v39  ;;  %v1188_v23 = vld [vmem:[#allocation2 + $0x250] ss:$8 sps:$4 sm:$0xff]   ;;  %v1060_v32 = vpack.c.bf16 %v794_v28, %v793_v27  ;;  %v795_v35 = vld [vmem:[%s1452_s3 + $0x20] sm:$0xff] }
  0x32   :  { %672 = vmatprep.subr.bf16.mxu1 %v1191_v40  ;;  %v1200_v39 = vld [vmem:[#allocation2 + $0x270] ss:$8 sps:$4 sm:$0xff]   ;;  %v1064_v40 = vpack.c.bf16 %v796_v36, %v795_v35  ;;  %v803_v13 = vld [vmem:[%s1452_s3 + $0x60] sm:$0xff] }
  0x33   :  { %v1236_v62 = vld [vmem:[#allocation2 + $0x2d0] ss:$8 sps:$4 sm:$0xff]  }
  0x34   :  { %718 = vmatpush1.bf16.msra.mxu0 %v1127_v24  ;;  %v1056_v24 = vpack.c.bf16 %v792_v19, %v791_v18  ;;  %v805_v19 = vld [vmem:[%s1452_s3 + $0x70] sm:$0xff] }
  0x35   :  { %719 = vmatprep.subr.bf16.mxu0 %v1128_v26  ;;  %673 = vmatpush1.bf16.msra.mxu1 %v1193_v43  ;;  %v1058_v26 = vpack.c.bf16 %v810_v21, %v809_v20  ;;  %v797_v43 = vld [vmem:[%s1452_s3 + $0x30] sm:$0xff]  ;;  %v806_v20 = vld [vmem:[%s1452_s3 + $0x78] sm:$0xff] }
  0x36   :  { %674 = vmatprep.subr.bf16.mxu1 %v1197_v44  ;;  %v798_v44 = vld [vmem:[%s1452_s3 + $0x38] sm:$0xff]  ;;  %v1084_v21 = vpack.c.bf16 %v806_v20, %v805_v19 }
  0x38   :  { %720 = vmatpush1.bf16.msra.mxu0 %v1130_v29  ;;  %v811_v29 = vld [vmem:[%s1452_s3 + $0xa0] sm:$0xff] }
  0x39   :  { %721 = vmatprep.subr.bf16.mxu0 %v1131_v30  ;;  %675 = vmatpush1.bf16.msra.mxu1 %v1199_v47  ;;  %v812_v30 = vld [vmem:[%s1452_s3 + $0xa8] sm:$0xff] }
  0x3a   :  { %676 = vmatprep.subr.bf16.mxu1 %v1203_v48  ;;  %v1206_v47 = vld [vmem:[#allocation2 + $0x280] ss:$8 sps:$4 sm:$0xff]   ;;  %v1068_v48 = vpack.c.bf16 %v798_v44, %v797_v43 }
  0x3c   :  { %722 = vmatpush1.bf16.msra.mxu0 %v1133_v33  ;;  %v1202_v33 = vld [vmem:[#allocation2 + $0x274] ss:$8 sps:$4 sm:$0xff]  }
  0x3d   :  { %723 = vmatprep.subr.bf16.mxu0 %v1134_v34  ;;  %677 = vmatpush1.bf16.msra.mxu1 %v1205_v51  ;;  %v1062_v34 = vpack.c.bf16 %v812_v30, %v811_v29  ;;  %v799_v51 = vld [vmem:[%s1452_s3 + $0x40] sm:$0xff] }
  0x3e   :  { %678 = vmatprep.subr.bf16.mxu1 %v1209_v52  ;;  %v800_v52 = vld [vmem:[%s1452_s3 + $0x48] sm:$0xff]  ;;  %v136_v29 = vld [vmem:[%s1451_s2] sm:$0x3] }
  0x40   :  { %724 = vmatpush1.bf16.msra.mxu0 %v1136_v37  ;;  %v813_v37 = vld [vmem:[%s1452_s3 + $0xb0] sm:$0xff] }
  0x41   :  { %725 = vmatprep.subr.bf16.mxu0 %v1137_v38  ;;  %679 = vmatpush1.bf16.msra.mxu1 %v1211_v55  ;;  %v814_v38 = vld [vmem:[%s1452_s3 + $0xb8] sm:$0xff]  ;;  %v1220_v55 = vld [vmem:[#allocation2 + $0x2a4] ss:$8 sps:$4 sm:$0xff]  }
  0x42   :  { %680 = vmatprep.subr.bf16.mxu1 %v1215_v56  ;;  %v1218_v56 = vld [vmem:[#allocation2 + $0x2a0] ss:$8 sps:$4 sm:$0xff]  }
  0x44   :  { %726 = vmatpush1.bf16.msra.mxu0 %v1139_v41  ;;  %v1208_v41 = vld [vmem:[#allocation2 + $0x284] ss:$8 sps:$4 sm:$0xff]  }
  0x45   :  { %727 = vmatprep.subr.bf16.mxu0 %v1140_v42  ;;  %681 = vmatpush1.bf16.msra.mxu1 %v1217_v60  ;;  %v1066_v42 = vpack.c.bf16 %v814_v38, %v813_v37  ;;  %v1230_v60 = vld [vmem:[#allocation2 + $0x2c0] ss:$8 sps:$4 sm:$0xff]  }
  0x46   :  { %682 = vmatprep.subr.bf16.mxu1 %v1221_v61  ;;  %v1238_v61 = vld [vmem:[#allocation2 + $0x2d4] ss:$8 sps:$4 sm:$0xff]  }
  0x48   :  { %728 = vmatpush1.bf16.msra.mxu0 %v1142_v45  ;;  %v815_v45 = vld [vmem:[%s1452_s3 + $0xc0] sm:$0xff] }
  0x49   :  { %729 = vmatprep.subr.bf16.mxu0 %v1143_v46  ;;  %683 = vmatpush1.bf16.msra.mxu1 %v1223_v0  ;;  %v816_v46 = vld [vmem:[%s1452_s3 + $0xc8] sm:$0xff] }
  0x4a   :  { %684 = vmatprep.subr.bf16.mxu1 %v1227_v3  ;;  %v1242_v0 = vld [vmem:[#allocation2 + $0x2e0] ss:$8 sps:$4 sm:$0xff]  }
  0x4b   :  { %v1251_v3 = vld [vmem:[%s1449_s0 + $0x10] ss:$24 sps:$4 sm:$0xff]  }
  0x4c   :  { %730 = vmatpush1.bf16.msra.mxu0 %v1145_v49  ;;  %v1214_v49 = vld [vmem:[#allocation2 + $0x294] ss:$8 sps:$4 sm:$0xff]  }
  0x4d   :  { %731 = vmatprep.subr.bf16.mxu0 %v1149_v50  ;;  %685 = vmatpush1.bf16.msra.mxu1 %v1229_v5  ;;  %v1070_v50 = vpack.c.bf16 %v816_v46, %v815_v45  ;;  %v818_v5 = vld [vmem:[%s1452_s3 + $0xd8] sm:$0xff] }
  0x4e   :  { %686 = vmatprep.subr.bf16.mxu1 %v1233_v7  ;;  %v801_v7 = vld [vmem:[%s1452_s3 + $0x50] sm:$0xff] }
  0x50   :  { %732 = vmatpush1.bf16.msra.mxu0 %v1151_v53  ;;  %v1212_v53 = vld [vmem:[#allocation2 + $0x290] ss:$8 sps:$4 sm:$0xff]  }
  0x51   :  { %744 = vmatprep.subr.bf16.mxu0 %v1160_v54  ;;  %687 = vmatpush1.bf16.msra.mxu1 %v1235_v9  ;;  %v1072_v54 = vpack.c.bf16 %v800_v52, %v799_v51 }
  0x52   :  { %688 = vmatprep.subr.bf16.mxu1 %v1239_v11  ;;  %v820_v11 = vld [vmem:[%s1452_s3 + $0xe8] sm:$0xff] }
  0x53   :  { %734 = vmatmul.mubr.bf16.vlgmr.msra.gmra.mrb[0].mxu0 %v1155_v57  ;;  %v1226_v57 = vld [vmem:[#allocation2 + $0x2b4] ss:$8 sps:$4 sm:$0xff]  }
  0x54   :  { %745 = vmatpush1.bf16.msra.mxu0 %v1158_v58  ;;  %776 = vmatprep.mubr.bf16.mxu0 %v1253_v1  ;;  %v1224_v58 = vld [vmem:[#allocation2 + $0x2b0] ss:$8 sps:$4 sm:$0xff]   ;;  %v1250_v1 = vld [vmem:[#allocation2 + $0x2f4] ss:$8 sps:$4 sm:$0xff]  }
  0x55   :  { %746 = vmatprep.subr.bf16.mxu0 %v1166_v59  ;;  %689 = vmatpush1.bf16.msra.mxu1 %v1241_v15  ;;  %v1232_v59 = vld [vmem:[#allocation2 + $0x2c4] ss:$8 sps:$4 sm:$0xff]  }
  0x56   :  { %1055 = vmatprep.subr.bf16.mxu1 %v1054_v17  ;;  %v822_v17 = vld [vmem:[%s1452_s3 + $0xf8] sm:$0xff] }
  0x58   :  { %747 = vmatpush1.bf16.msra.mxu0 %v1164_v63  ;;  %691 = vmatmul.mubr.bf16.vlgmr.msra.gmra.mrb[0].mxu1 %v1245_v22  ;;  %v1244_v63 = vld [vmem:[#allocation2 + $0x2e4] ss:$8 sps:$4 sm:$0xff]  }
  0x59   :  { %748 = vmatprep.subr.bf16.mxu0 %v1172_v2  ;;  %1057 = vmatpush3.bf16.msra.mxu1 %v1056_v24  ;;  %v1248_v2 = vld [vmem:[#allocation2 + $0x2f0] ss:$8 sps:$4 sm:$0xff]  }
  0x5a   :  { %1059 = vmatprep.subr.bf16.mxu1 %v1058_v26  ;;  %v138_v26 = vlaneseq }
  0x5c   :  { %749 = vmatpush1.bf16.msra.mxu0 %v1170_v4  ;;  %v817_v4 = vld [vmem:[%s1452_s3 + $0xd0] sm:$0xff]  ;;  %v139_v27 = vshrl.u32 %v138_v26, 7 }
  0x5d   :  { %750 = vmatprep.subr.bf16.mxu0 %v1178_v6  ;;  %1061 = vmatpush3.bf16.msra.mxu1 %v1060_v32  ;;  %v1074_v6 = vpack.c.bf16 %v818_v5, %v817_v4 }
  0x5e   :  { %1063 = vmatprep.subr.bf16.mxu1 %v1062_v34  ;;  %v140_v28 = vsub.s32 0, %v139_v27  ;;  %v144_v30 = vsub.s32 1, %v139_v27 }
  0x60   :  { %751 = vmatpush1.bf16.msra.mxu0 %v1176_v8  ;;  %v802_v8 = vld [vmem:[%s1452_s3 + $0x58] sm:$0xff]  ;;  %v145_v32 = vrot.slane %v136_v29, %v144_v30 }
  0x61   :  { %752 = vmatprep.subr.bf16.mxu0 %v1184_v10  ;;  %1065 = vmatpush3.bf16.msra.mxu1 %v1064_v40  ;;  %v1076_v9 = vpack.c.bf16 %v802_v8, %v801_v7  ;;  %v819_v10 = vld [vmem:[%s1452_s3 + $0xe0] sm:$0xff] }
  0x62   :  { %1067 = vmatprep.subr.bf16.mxu1 %v1066_v42  ;;  %v1078_v12 = vpack.c.bf16 %v820_v11, %v819_v10 }
  0x64   :  { %753 = vmatpush1.bf16.msra.mxu0 %v1182_v14  ;;  %v804_v14 = vld [vmem:[%s1452_s3 + $0x68] sm:$0xff] }
  0x65   :  { %754 = vmatprep.subr.bf16.mxu0 %v1190_v16  ;;  %1069 = vmatpush3.bf16.msra.mxu1 %v1068_v48  ;;  %v1080_v15 = vpack.c.bf16 %v804_v14, %v803_v13  ;;  %v821_v16 = vld [vmem:[%s1452_s3 + $0xf0] sm:$0xff] }
  0x66   :  { %1071 = vmatprep.subr.bf16.mxu1 %v1070_v50  ;;  %v1082_v18 = vpack.c.bf16 %v822_v17, %v821_v16  ;;  %v1015_v50 = vld [vmem:[%s1453_s4] ss:$0 sm:$0xff] }
  0x68   :  { %755 = vmatpush1.bf16.msra.mxu0 %v1188_v23 }
  0x69   :  { %756 = vmatprep.subr.bf16.mxu0 %v1196_v25  ;;  %1073 = vmatpush3.bf16.msra.mxu1 %v1072_v54 }
  0x6a   :  { %1075 = vmatprep.subr.bf16.mxu1 %v1074_v6 }
  0x6c   :  { %757 = vmatpush1.bf16.msra.mxu0 %v1194_v31  ;;  %v141_v31 = vrot.slane %v136_v29, %v140_v28 }
  0x6d   :  { %758 = vmatprep.subr.bf16.mxu0 %v1202_v33  ;;  %1077 = vmatpush3.bf16.msra.mxu1 %v1076_v9 }
  0x6e   :  { %1079 = vmatprep.subr.bf16.mxu1 %v1078_v12 }
  0x70   :  { %759 = vmatpush1.bf16.msra.mxu0 %v1200_v39 }
  0x71   :  { %760 = vmatprep.subr.bf16.mxu0 %v1208_v41  ;;  %1081 = vmatpush3.bf16.msra.mxu1 %v1080_v15 }
  0x72   :  { %1083 = vmatprep.subr.bf16.mxu1 %v1082_v18 }
  0x74   :  { %761 = vmatpush1.bf16.msra.mxu0 %v1206_v47 }
  0x75   :  { %762 = vmatprep.subr.bf16.mxu0 %v1214_v49  ;;  %1085 = vmatpush3.bf16.msra.mxu1 %v1084_v21 }
  0x78   :  { %763 = vmatpush1.bf16.msra.mxu0 %v1212_v53 }
  0x79   :  { %764 = vmatprep.subr.bf16.mxu0 %v1220_v55 }
  0x7c   :  { %765 = vmatpush1.bf16.msra.mxu0 %v1218_v56 }
  0x7d   :  { %766 = vmatprep.subr.bf16.mxu0 %v1226_v57 }
  0x80   :  { %767 = vmatpush1.bf16.msra.mxu0 %v1224_v58 }
  0x81   :  { %768 = vmatprep.subr.bf16.mxu0 %v1232_v59 }
  0x84   :  { %769 = vmatpush1.bf16.msra.mxu0 %v1230_v60 }
  0x85   :  { %770 = vmatprep.subr.bf16.mxu0 %v1238_v61 }
  0x88   :  { %771 = vmatpush1.bf16.msra.mxu0 %v1236_v62 }
  0x89   :  { %772 = vmatprep.subr.bf16.mxu0 %v1244_v63 }
  0x8c   :  { %773 = vmatpush1.bf16.msra.mxu0 %v1242_v0 }
  0x8d   :  { %774 = vmatprep.subr.bf16.mxu0 %v1250_v1 }
  0x90   :  { %775 = vmatpush1.bf16.msra.mxu0 %v1248_v2 }
  0x93   :  { %777 = vmatmul.mubr.bf16.vlgmr.msra.gmra.mrb[0].mxu0 %v1251_v3 }
 0x12b   :  { %v692_v22 = vpop.f32.mrb[0].mxu1 }
 0x12c   :  { %v694_v23 = vpop.f32.mrb[1].mxu1  ;;  %v693_v33 = vadd.f32 %v692_v22, %v141_v31 }
 0x12d   :  { %v696_v24 = vpop.f32.mrb[2].mxu1  ;;  %v695_v34 = vadd.f32 %v694_v23, %v145_v32 }
 0x12e   :  { %v698_v25 = vpop.f32.mrb[3].mxu1  ;;  %v697_v36 = vadd.f32 %v696_v24, %v141_v31 }
 0x12f   :  { %v699_v39 = vadd.f32 %v698_v25, %v145_v32 }
 0x166   :  { %v778_v35 = vpop.f32.mrb[0].mxu0 }
 0x167   :  { %v1087_v37 = vadd.f32 %v778_v35, %v693_v33  ;;  %v780_v38 = vpop.f32.mrb[1].mxu0 }
 0x168   :  { %v1089_v40 = vadd.f32 %v780_v38, %v695_v34  ;;  %v782_v41 = vpop.f32.mrb[2].mxu0 }
 0x169   :  { %v1091_v42 = vadd.f32 %v782_v41, %v697_v36  ;;  %v784_v43 = vpop.f32.mrb[3].mxu0  ;;  %v787_v46 = vmax.f32 %v1087_v37, 0.0 }
 0x16a   :  { %v788_v44 = vmax.f32 %v1089_v40, 0.0  ;;  %v1093_v45 = vadd.f32 %v784_v43, %v699_v39 }
 0x16b   :  { %v789_v48 = vmax.f32 %v1091_v42, 0.0 }
 0x16c   :  { %v790_v47 = vmax.f32 %v1093_v45, 0.0  ;;  %894 = vmatprep.mubr.f32.mxu1 %v788_v44 }
 0x16d   :  { %895 = vmatmul.mubr.f32.vlgmr.msra.gmra.mrb[4].mxu1 %v787_v46 }
 0x16e   :  { %899 = vmatprep.mubr.f32.mxu1 %v790_v47 }
 0x171   :  { %900 = vmatmul.mubr.f32.gmra.mrb[6].mxu1 %v789_v48 }
 0x240   :  { %v1048_v49 = vpop.f32.mrb[4].mxu1 }
 0x241   :  { %v1049_v51 = vpop.f32.mrb[5].mxu1 }
 0x242   :  { %v1050_v52 = vadd.f32 %v1049_v51, %v1048_v49 }
 0x244   :  { %v897_v53 = vadd.f32 %v1050_v52, %v1015_v50  ;;  %v1051_v54 = vpop.f32.mrb[6].mxu1 }
 0x245   :  { %v1052_v55 = vpop.f32.mrb[7].mxu1 }
 0x246   :  { %906 = vst.msk [vmem:[%s1454_s5] sm:$0xff] %vm905_vm0, %v897_v53  ;;  %v1053_v56 = vadd.f32 %v1052_v55, %v1051_v54 }
 0x248   :  { %v902_v57 = vadd.f32 %v1053_v56, %v1015_v50 }
 0x24a   :  { %907 = vst.msk [vmem:[%s1454_s5 + $0x8] sm:$0xff] %vm905_vm0, %v902_v57 }
 0x24b   :  { %912 = vsyncpa [#allocation3], 1 }

</bundles_post_ra>
